<compile_context>
chip_gen: v7x
topology: tpu7x:2x2x1
jax: 0.10.0
libtpu: 0.0.40
codegen_flags: <defaults>
</compile_context>

<pallas_src>
import functools
import math

import jax
import jax.numpy as jnp
from jax import lax
from jax.experimental import pallas as pl
from jax.experimental.pallas import tpu as pltpu

_LANES = 128
_SUBLANES = 8
_CHUNK_ROWS = 32  # rows folded per fori_loop step (4 vregs per input stream)


def _round_up(x, m):
    return ((x + m - 1) // m) * m


@functools.lru_cache(maxsize=None)
def _device_kind():
    try:
        return jax.devices()[0].device_kind.lower()
    except Exception:
        return ""


def _is_v7x():
    kind = _device_kind()
    return ("v7" in kind) or ("tpu7" in kind) or ("7x" in kind)


def _max_block_rows(for_reduction):
    """Generation-aware cap on rows of one (rows, 128) f32 input tile."""
    kind = _device_kind()
    if "v5 lite" in kind or "v5e" in kind or "v5lite" in kind:
        return 2048                                  # v5e: 16 MiB scoped VMEM
    if "v6" in kind:
        return 4096                                  # v6e: 32 MiB scoped VMEM
    if _is_v7x():
        return 8192 if for_reduction else 4096       # amortize ~0.35us/step
    return 2048                                      # unknown: conservative


def _pick_blocking(rows, *, for_reduction):
    """Choose (block_rows, num_blocks) for the 1-D grid over row blocks."""
    cap = _max_block_rows(for_reduction)
    if rows > cap:
        block = cap
    else:
        block = rows
        # Split single-block problems with enough work so that
        # dimension_semantics=("parallel",) can shard over v7x's two TCs.
        if _is_v7x() and rows >= 1024:
            block = _round_up(pl.cdiv(rows, 2), _CHUNK_ROWS)
    return block, pl.cdiv(rows, block)


def _pick_chunk_rows(block_rows):
    chunk = min(_CHUNK_ROWS, block_rows)
    while block_rows % chunk:
        chunk -= _SUBLANES
    return chunk


@functools.lru_cache(maxsize=None)
def _roll_shift_down_one():
    """Static shift s with pltpu.roll(x, s, axis=-1)[..., i] == x[..., i + 1].

    Probes the lane-rotate convention once (tiny one-off kernel, cached) so the
    in-kernel mu/log_var de-interleave is direction-proof.
    """
    def probe(x_ref, o_ref):
        o_ref[...] = pltpu.roll(x_ref[...], _LANES - 1, axis=1)

    x = lax.broadcasted_iota(jnp.int32, (_SUBLANES, _LANES), 1)
    out = pl.pallas_call(
        probe, out_shape=jax.ShapeDtypeStruct((_SUBLANES, _LANES), jnp.int32))(x)
    first = int(jax.device_get(out)[0, 0])
    if first == 1:             # np.roll convention: result[i] = x[i + 1]
        return _LANES - 1
    if first == _LANES - 1:    # opposite convention: result[i] = x[i + shift]
        return 1
    raise RuntimeError(f"unexpected pltpu.roll semantics (probe value {first})")


def _nll_terms(mu, log_var, y, *, threshold, penalty_weight):
    """Elementwise Gaussian NLL + low-variance penalty (matches the reference)."""
    sigma_sq = jnp.exp(log_var) + 1e-06
    nll = 0.5 * jnp.log(2.0 * math.pi * sigma_sq) + (y - mu) ** 2 / (2.0 * sigma_sq)
    # The reference's (sigma_sq < threshold) mask is redundant with the clamp.
    return nll + penalty_weight * jnp.maximum(threshold - sigma_sq, 0.0)


def _guiss_sum_kernel(x_ref, y_ref, psum_ref, *, threshold, penalty_weight,
                      block_rows, chunk_rows, roll_shift, two_n, needs_mask):
    """Reduction path.

    x_ref:    (block_rows, 128) raw interleaved [mu0, lv0, mu1, lv1, ...].
    y_ref:    (block_rows, 128) targets repeated onto both lanes of each pair.
    psum_ref: (8, 128) per-block partial sum (folded to a scalar in the wrapper).
    """
    lane = lax.broadcasted_iota(jnp.int32, (chunk_rows, _LANES), 1)
    even = (lane & 1) == 0                      # lanes holding mu (valid pairs)
    if needs_mask:
        row = lax.broadcasted_iota(jnp.int32, (chunk_rows, _LANES), 0)
        rowlane = row * _LANES + lane           # flat offset within a chunk
        block_base = pl.program_id(0) * (block_rows * _LANES)

    def body(c, acc):
        r0 = pl.multiple_of(c * chunk_rows, _SUBLANES)
        x = x_ref[pl.ds(r0, chunk_rows), :]
        yv = y_ref[pl.ds(r0, chunk_rows), :]
        # One XLU lane-roll brings log_var under its mu's (even) lane.
        log_var = pltpu.roll(x, roll_shift, axis=1)
        nll = _nll_terms(x, log_var, yv,
                         threshold=threshold, penalty_weight=penalty_weight)
        if needs_mask:
            flat = block_base + r0 * _LANES + rowlane
            keep = jnp.logical_and(even, flat < two_n)
        else:
            keep = even
        nll = jnp.where(keep, nll, 0.0)
        return acc + jnp.sum(
            nll.reshape(chunk_rows // _SUBLANES, _SUBLANES, _LANES), axis=0)

    acc = lax.fori_loop(0, block_rows // chunk_rows, body,
                        jnp.zeros((_SUBLANES, _LANES), jnp.float32))
    psum_ref[...] = acc


def _guiss_map_kernel(ml_ref, y_ref, nll_ref, *, threshold, penalty_weight):
    """'none' path: ml_ref holds de-interleaved (2, block_rows, 128) planes."""
    nll_ref[...] = _nll_terms(ml_ref[0], ml_ref[1], y_ref[...],
                              threshold=threshold, penalty_weight=penalty_weight)


def _guiss_reduce(outputs, y_flat, n, threshold, penalty_weight, reduction):
    two_n = 2 * n
    rows = _round_up(pl.cdiv(two_n, _LANES), _SUBLANES)
    block_rows, num_blocks = _pick_blocking(rows, for_reduction=True)
    chunk_rows = _pick_chunk_rows(block_rows)
    padded = rows * _LANES
    # Compile the (3-op/elem) validity mask in only when the stream really has
    # padded / ragged tails; aligned shapes get the mask-free hot loop.
    needs_mask = (num_blocks * block_rows * _LANES) != two_n

    # Raw interleaved stream: no wrapper de-interleave pass over `outputs`.
    x = outputs.reshape(-1)
    # y duplicated onto both lanes of its pair (one coalesced pass over the
    # half-sized target tensor) so it lines up with the mu lanes in-kernel.
    y2 = jnp.repeat(y_flat[:, None], 2, axis=1).reshape(-1)
    if padded != two_n:
        x = jnp.pad(x, (0, padded - two_n))
        y2 = jnp.pad(y2, (0, padded - two_n))
    x = x.reshape(rows, _LANES)
    y2 = y2.reshape(rows, _LANES)

    kernel = functools.partial(
        _guiss_sum_kernel,
        threshold=threshold, penalty_weight=penalty_weight,
        block_rows=block_rows, chunk_rows=chunk_rows,
        roll_shift=_roll_shift_down_one(), two_n=two_n, needs_mask=needs_mask)

    cost = pl.CostEstimate(
        flops=16 * n, transcendentals=2 * n,
        bytes_accessed=2 * padded * 4 + num_blocks * _SUBLANES * _LANES * 4)

    psums = pl.pallas_call(
        kernel,
        out_shape=jax.ShapeDtypeStruct((num_blocks * _SUBLANES, _LANES),
                                       jnp.float32),
        grid_spec=pltpu.PrefetchScalarGridSpec(
            num_scalar_prefetch=0,
            grid=(num_blocks,),
            in_specs=[pl.BlockSpec((block_rows, _LANES), lambda i: (i, 0)),
                      pl.BlockSpec((block_rows, _LANES), lambda i: (i, 0))],
            out_specs=pl.BlockSpec((_SUBLANES, _LANES), lambda i: (i, 0))),
        compiler_params=pltpu.CompilerParams(
            dimension_semantics=("parallel",)),
        cost_estimate=cost,
    )(x, y2)

    total = jnp.sum(psums)
    if reduction == 'mean':
        return total / jnp.float32(n)
    return total


def _guiss_none(outputs, y_flat, B, T, n, threshold, penalty_weight):
    rows = pl.cdiv(n, _LANES)
    block_rows, num_blocks = _pick_blocking(rows, for_reduction=False)
    padded = rows * _LANES

    # Output traffic dominates the 'none' path, so present lane-dense
    # de-interleaved mu / log_var planes (one fused transpose+pad pass) and
    # write the per-element nll directly; emitting an interleaved nll and
    # strided-slicing it afterwards would cost more HBM round trips.
    ml = jnp.transpose(outputs, (2, 0, 1)).reshape(2, n)
    y = y_flat
    if padded != n:
        ml = jnp.pad(ml, ((0, 0), (0, padded - n)))
        y = jnp.pad(y, (0, padded - n))
    ml = ml.reshape(2, rows, _LANES)
    y = y.reshape(rows, _LANES)

    kernel = functools.partial(_guiss_map_kernel, threshold=threshold,
                               penalty_weight=penalty_weight)
    cost = pl.CostEstimate(flops=16 * n, transcendentals=2 * n,
                           bytes_accessed=4 * padded * 4)

    nll = pl.pallas_call(
        kernel,
        out_shape=jax.ShapeDtypeStruct((rows, _LANES), jnp.float32),
        grid_spec=pltpu.PrefetchScalarGridSpec(
            num_scalar_prefetch=0,
            grid=(num_blocks,),
            in_specs=[pl.BlockSpec((2, block_rows, _LANES), lambda i: (0, i, 0)),
                      pl.BlockSpec((block_rows, _LANES), lambda i: (i, 0))],
            out_specs=pl.BlockSpec((block_rows, _LANES), lambda i: (i, 0))),
        compiler_params=pltpu.CompilerParams(
            dimension_semantics=("parallel",)),
        cost_estimate=cost,
    )(ml, y)

    flat = nll.reshape(-1)
    if padded != n:
        flat = flat[:n]  # skipped entirely when B*T is a multiple of 128
    return flat.reshape(B, T)


def guiss_loss(outputs, y_true, *, threshold=0.5, penalty_weight=1.0,
               reduction='mean'):
    """JAX/Pallas equivalent of GuissLoss.forward.

    Args:
      outputs: (B, T, 2); [..., 0] = mu, [..., 1] = log_var.
      y_true:  (B, T, 1) or (B, T).
    Returns:
      scalar for 'mean'/'sum', or a (B, T) array otherwise.
    """
    outputs = jnp.asarray(outputs, jnp.float32)
    y_true = jnp.asarray(y_true, jnp.float32)
    if y_true.ndim == 3 and y_true.shape[-1] == 1:
        y_true = jnp.squeeze(y_true, axis=-1)

    B, T = outputs.shape[0], outputs.shape[1]
    n = B * T
    if 2 * n >= 2 ** 31:
        raise ValueError("GuissLoss kernel assumes int32-safe flat indices.")

    threshold = float(threshold)
    penalty_weight = float(penalty_weight)
    y_flat = y_true.reshape(n)

    if reduction in ('mean', 'sum'):
        return _guiss_reduce(outputs, y_flat, n, threshold, penalty_weight,
                             reduction)
    return _guiss_none(outputs, y_flat, B, T, n, threshold, penalty_weight)


def _guiss_loss_ref(outputs, y_true, threshold=0.5, penalty_weight=1.0,
                    reduction='mean'):
    """Pure-JAX reference (mirrors the PyTorch forward exactly)."""
    outputs = jnp.asarray(outputs, jnp.float32)
    y_true = jnp.asarray(y_true, jnp.float32)
    mu = outputs[:, :, 0]
    log_var = outputs[:, :, 1]
    if y_true.ndim == 3 and y_true.shape[-1] == 1:
        y_true = jnp.squeeze(y_true, axis=-1)
    sigma_sq = jnp.exp(log_var) + 1e-06
    nll = 0.5 * jnp.log(2 * math.pi * sigma_sq) + (y_true - mu) ** 2 / (2 * sigma_sq)
    penalty_mask = (sigma_sq < threshold).astype(nll.dtype)
    penalty_term = penalty_weight * penalty_mask * jnp.maximum(threshold - sigma_sq, 0.0)
    nll = nll + penalty_term
    if reduction == 'mean':
        return nll.mean()
    elif reduction == 'sum':
        return nll.sum()
    return nll


if __name__ == "__main__":
    key = jax.random.PRNGKey(0)

    ok = True
    # (2, 8): padded/masked path.  (8, 64): lane-aligned, mask-free fast path.
    for batch, output_steps in ((2, 8), (8, 64)):
        k1, k2 = jax.random.split(jax.random.fold_in(key, batch))
        outputs = jax.random.normal(k1, (batch, output_steps, 2),
                                    dtype=jnp.float32)
        y_true = jax.random.normal(k2, (batch, output_steps, 1),
                                   dtype=jnp.float32)
        for red in ('mean', 'sum', 'none'):
            got = jax.block_until_ready(
                guiss_loss(outputs, y_true, threshold=0.5, penalty_weight=1.0,
                           reduction=red))
            ref = jax.block_until_ready(
                _guiss_loss_ref(outputs, y_true, threshold=0.5,
                                penalty_weight=1.0, reduction=red))
            if not jnp.allclose(got, ref, rtol=1e-5, atol=1e-5):
                ok = False
                print(f"MISMATCH shape=({batch},{output_steps}) "
                      f"reduction={red}: got={got} ref={ref}")

    if not ok:
        raise SystemExit(1)
    print("KERNEL_OK")
</pallas_src>

<mosaic_0001>
module attributes {stable_mosaic.version = 11 : i64} {
  func.func @probe(%arg0: memref<8x128xi32, #tpu.memory_space<vmem>>, %arg1: memref<8x128xi32, #tpu.memory_space<vmem>>) attributes {dimension_semantics = [], scalar_prefetch = 0 : i64, scratch_operands = 0 : i64, tpu.core_type = #tpu.core_type<tc>} {
    %c0 = arith.constant 0 : index
    %c0_0 = arith.constant 0 : index
    %0 = vector.load %arg0[%c0, %c0_0] : memref<8x128xi32, #tpu.memory_space<vmem>>, vector<8x128xi32>
    %c127_i32 = arith.constant 127 : i32
    %1 = tpu.dynamic_rotate %0 by %c127_i32 dim 1 : vector<8x128xi32>, i32 -> vector<8x128xi32>
    %c0_1 = arith.constant 0 : index
    %c0_2 = arith.constant 0 : index
    %2 = vector.load %arg1[%c0_1, %c0_2] : memref<8x128xi32, #tpu.memory_space<vmem>>, vector<8x128xi32>
    tpu.vector_store %arg1[%c0_1, %c0_2], %1 {strides = array<i32>} : memref<8x128xi32, #tpu.memory_space<vmem>>, vector<8x128xi32>,
    return
  }
}

</mosaic_0001>

<bundles_post_ra>
// kernel: tpu_custom_call.1
= control target key start
LH: loop header
LB: loop body
LE: loop exit
PB: predicated region body
PF: predicated region fallthrough
CT: control target
= control target key end

     0   :  { %6 = vsyncpa [#allocation3], 0  ;;  %s128_s0 = inlined_call_operand.hbm [shape: s32[8,128], index: 0, kind: input, shape index: {}]   ;;  %s129_s1 = inlined_call_operand.hbm [shape: s32[8,128], index: 1, kind: output, shape index: {}]  }
   0x1   :  { %7 = vsyncpa [#allocation4], 0  ;;  %s91_s6 = smov [#allocation2]   ;;  %s43_s10 = scalar_lea.hbm %s128_s0, 128 }
   0x2   :  { %s14_s7 = sshll.u32 %s91_s6, 4  ;;  %p44_p0 = scmp.ne.s32.totalorder %s128_s0, %s43_s10  ;;  %s15_s7 = int_to_ptr.vmem [resolvable:$true] %s14_s7 }
   0x3   :  { %p47_p1 = scmp.lt.u32.totalorder %s43_s10, %s128_s0 }
   0x5   :  { %p49_p2 = pnand %p47_p1, %p44_p0 }
   0x7   :  { %52 = shalt.err (!%p49_p2)
}
   0x8   :  { %s53_s15 = scalar_lea.vmem %s15_s7, 128  ;;  %p58_p4 = scmp.lt.s32.totalorder %s15_s7, %s15_s7 }
   0x9   :  { %p54_p3 = scmp.ne.s32.totalorder %s15_s7, %s53_s15  ;;  %p59_p5 = scmp.lt.s32.totalorder %s53_s15, %s53_s15 }
   0xb   :  { %p60_p6 = por %p59_p5, %p58_p4 }
   0xd   :  { %p61_p7 = pnand %p60_p6, %p54_p3 }
   0xf   :  { %64 = shalt.err (!%p61_p7)
}
  0x10   :  { %17 = dma.hbm_to_vmem [thread:$0]  %s128_s0, 128, %s15_s7, [#allocation3]  }
  0x11   :  { %87 = dma.done.wait [#allocation3], 128  }
  0x12   :  { %88 = vsyncadd [#allocation3], 4294967168  ;;  %v21_v0 = vld [vmem:[#allocation2] sm:$0xff]  ;;  %s92_s18 = smov 127   ;;  %s93_s19 = smov [#allocation5]  }
  0x13   :  { %22 = vrot.lane.b32.xlu0 %v21_v0, %s92_s18  ;;  %s31_s20 = sshll.u32 %s93_s19, 4  ;;  %s32_s20 = int_to_ptr.vmem [resolvable:$true] %s31_s20 }
  0x14   :  { %s65_s21 = scalar_lea.vmem %s32_s20, 128  ;;  %p70_p9 = scmp.lt.s32.totalorder %s32_s20, %s32_s20 }
  0x15   :  { %p66_p8 = scmp.ne.s32.totalorder %s32_s20, %s65_s21  ;;  %p71_p10 = scmp.lt.s32.totalorder %s65_s21, %s65_s21 }
  0x17   :  { %p72_p11 = por %p71_p10, %p70_p9 }
  0x19   :  { %p73_p12 = pnand %p72_p11, %p66_p8 }
  0x85   :  { %v23_v1 = vpop.permute.xlu0 %22 }
  0x86   :  { %24 = vst [vmem:[#allocation5] sm:$0xff] %v23_v1 }
  0x87   :  { %76 = shalt.err (!%p73_p12)
}
  0x88   :  { %s77_s0 = scalar_lea.hbm %s129_s1, 128 }
  0x89   :  { %p78_p13 = scmp.ne.s32.totalorder %s129_s1, %s77_s0  ;;  %p81_p0 = scmp.lt.u32.totalorder %s77_s0, %s129_s1 }
  0x8b   :  { %p83_p1 = pnand %p81_p0, %p78_p13 }
  0x8d   :  { %86 = shalt.err (!%p83_p1)
}
  0x8e   :  { %34 = dma.vmem_to_hbm [thread:$0]  %s32_s20, 128, %s129_s1, [#allocation4]  }
  0x8f   :  { %89 = dma.done.wait [#allocation4], 128  }
  0x90   :  { %90 = vsyncadd [#allocation4], 4294967168 }
  0x91   :  { %38 = vsyncpa [#allocation3], 1 }
  0x92   :  { %39 = vsyncpa [#allocation4], 1 }

</bundles_post_ra>
